<compile_context>
chip_gen: v7x
topology: tpu7x:2x2x1
jax: 0.10.0
libtpu: 0.0.40
codegen_flags: <defaults>
</compile_context>

<pallas_src>
import jax
import jax.numpy as jnp
from jax import lax
from jax.experimental import pallas as pl
from jax.experimental.pallas import tpu as pltpu  # noqa: F401  (TPU backend)

# ---- problem sizes (small, consistent with the module's forward) ----------
B = 8            # batch size
D = 32           # state dimension (x0, x1, y, z, bt, ct all have trailing dim D)
H = 64           # hidden width of b_net / c_net
F = 4 * D        # MLP input features: [xt, x0, y, t]  -> 128
NUM_MC = 4       # num_mc_samples
R = NUM_MC * B   # fused matmul row count (MC axis folded into rows)
SIGMA0 = 0.5     # interpolant noise scale


# ---------------------------------------------------------------------------
# Pallas kernel: ONE invocation handles every MC sample (rows = NUM_MC*B).
# ---------------------------------------------------------------------------
def _objective_kernel(t_ref, z_ref, xxy_ref, w1_ref, b1_ref, w2_ref, b2_ref,
                      out_ref):
    t_col = t_ref[...]                       # (R, 1)
    z = z_ref[...]                           # (R, D)
    x0_b = xxy_ref[0]                        # (B, D)
    x1_b = xxy_ref[1]                        # (B, D)
    y_b = xxy_ref[2]                         # (B, D)

    # Tile batch tensors across MC samples (rows are MC-major: r = mc*B + b).
    x0 = jnp.tile(x0_b, (NUM_MC, 1))         # (R, D)
    x1 = jnp.tile(x1_b, (NUM_MC, 1))         # (R, D)
    t = jnp.broadcast_to(t_col, (R, D))      # (R, D)

    # ---- interpolant / velocity / sigma (elementwise, (R, D)) ---------------
    one_minus_t = 1.0 - t
    xt = one_minus_t * x0 + t * x1 + SIGMA0 * t * one_minus_t * z
    rt = x1 - x0 + SIGMA0 * (1.0 - 2.0 * t) * z
    sigma = SIGMA0 * one_minus_t

    # ---- fused b_net / c_net, layer 1 via partial matmuls (no lane concat) --
    # MC-invariant contributions at batch size, then tiled across MC rows.
    h_const_b = (jnp.dot(x0_b, w1_ref[D:2 * D, :],
                         preferred_element_type=jnp.float32)
                 + jnp.dot(y_b, w1_ref[2 * D:3 * D, :],
                           preferred_element_type=jnp.float32)
                 + b1_ref[...])                                  # (B, 2H)
    h_const = jnp.tile(h_const_b, (NUM_MC, 1))                   # (R, 2H)
    # t is broadcast along the feature dim -> its matmul contribution is rank-1.
    w1t_rowsum = jnp.sum(w1_ref[3 * D:4 * D, :], axis=0, keepdims=True)  # (1,2H)
    h_t = t_col * w1t_rowsum                                     # (R, 2H)

    h = jnp.tanh(jnp.dot(xt, w1_ref[0:D, :],
                         preferred_element_type=jnp.float32) + h_const + h_t)

    # layer 2: block-diagonal (2H, 2D) -> [bt | ct] in one push
    out2 = jnp.dot(h, w2_ref[...],
                   preferred_element_type=jnp.float32) + b2_ref[...]   # (R, 2D)
    bt = out2[:, :D]
    ct = out2[:, D:]

    # ---- losses, fully reduced in-kernel ------------------------------------
    # per-sample mse means then mean over MC == mean over all R*D elements;
    # the 2*sum(.) term is summed per sample then averaged over MC == (2/M)*sum.
    inv_n = 1.0 / float(R * D)
    b_loss = jnp.sum((bt - rt) ** 2) * inv_n
    bt_det = lax.stop_gradient(bt)    # mirrors PyTorch .detach(); forward-identical
    c_loss = (jnp.sum((ct * sigma - rt) ** 2) * inv_n
              + (2.0 / float(NUM_MC)) * jnp.sum(sigma * ct * bt_det))
    loss = b_loss + c_loss
    # TODO(synk): autodiff through pallas_call needs a custom_vjp to reproduce
    # the PyTorch gradient (detach semantics); forward values are exact.

    # single lane-dense (8,128) unmasked store; rows 0/1/2 = loss/b_loss/c_loss
    rows = lax.broadcasted_iota(jnp.int32, (8, 128), 0)
    out_ref[...] = jnp.where(
        rows == 0, loss,
        jnp.where(rows == 1, b_loss, jnp.where(rows == 2, c_loss, 0.0)))


# ---------------------------------------------------------------------------
# Wrapper
# ---------------------------------------------------------------------------
def fuse_params(params):
    """One-time fusion of b_net / c_net weights (hoisted out of the call path)."""
    w1 = jnp.concatenate([params["w1b"], params["w1c"]], axis=1)        # (F, 2H)
    b1 = jnp.concatenate([params["b1b"], params["b1c"]], axis=1)        # (1, 2H)
    zpad = jnp.zeros((H, D), jnp.float32)
    w2 = jnp.concatenate(
        [jnp.concatenate([params["w2b"], zpad], axis=1),
         jnp.concatenate([zpad, params["w2c"]], axis=1)], axis=0)       # (2H, 2D)
    b2 = jnp.concatenate([params["b2b"], params["b2c"]], axis=1)        # (1, 2D)
    return dict(w1=w1, b1=b1, w2=w2, b2=b2)


@jax.jit
def controlled_drift_objective_pallas(x0, x1, y, t, z, fused):
    """t: (NUM_MC, B), z: (NUM_MC, B, D), fused: pre-fused weights."""
    num_mc, batch = t.shape
    dim = x0.shape[-1]

    # layout plumbing only (tiny reshapes / one stack); MC axis folded into rows
    t_col = t.reshape(num_mc * batch, 1).astype(jnp.float32)            # (R, 1)
    z_rows = z.reshape(num_mc * batch, dim).astype(jnp.float32)         # (R, D)
    xxy = jnp.stack([x0, x1, y], axis=0).astype(jnp.float32)            # (3, B, D)

    # Single invocation; every operand fits whole in VMEM (~150 KiB total),
    # so no grid / tiling is needed.
    out = pl.pallas_call(
        _objective_kernel,
        out_shape=jax.ShapeDtypeStruct((8, 128), jnp.float32),
    )(t_col, z_rows, xxy, fused["w1"], fused["b1"], fused["w2"], fused["b2"])

    return {"loss": out[0, 0], "b_loss": out[1, 0], "c_loss": out[2, 0]}


# ---------------------------------------------------------------------------
# Pure-JAX reference (mirrors the PyTorch forward loop) for a sanity check.
# ---------------------------------------------------------------------------
def controlled_drift_objective_ref(x0, x1, y, t, z, params):
    losses, b_losses, c_losses = [], [], []
    for s in range(t.shape[0]):
        ts = t[s][:, None]                                   # (B, 1)
        zs = z[s]
        alpha = 1.0 - ts
        xt = alpha * x0 + ts * x1 + SIGMA0 * ts * alpha * zs
        rt = x1 - x0 + SIGMA0 * (1.0 - 2.0 * ts) * zs
        sigma = SIGMA0 * (1.0 - ts)
        feat = jnp.concatenate([xt, x0, y, jnp.broadcast_to(ts, x0.shape)], -1)

        def mlp(w1, b1, w2, b2):
            return jnp.tanh(feat @ w1 + b1) @ w2 + b2

        bt = mlp(params["w1b"], params["b1b"], params["w2b"], params["b2b"])
        ct = mlp(params["w1c"], params["b1c"], params["w2c"], params["b2c"])
        b_loss = jnp.mean((bt - rt) ** 2)
        c_loss = jnp.mean((ct * sigma - rt) ** 2) + 2.0 * jnp.sum(sigma * ct * bt)
        losses.append(b_loss + c_loss)
        b_losses.append(b_loss)
        c_losses.append(c_loss)
    return {
        "loss": jnp.mean(jnp.stack(losses)),
        "b_loss": jnp.mean(jnp.stack(b_losses)),
        "c_loss": jnp.mean(jnp.stack(c_losses)),
    }


def _init_params(key):
    ks = jax.random.split(key, 4)

    def lin(kw, fan_in, shape_w, shape_b):
        w = jax.random.normal(kw, shape_w, jnp.float32) / jnp.sqrt(float(fan_in))
        b = jnp.zeros(shape_b, jnp.float32)
        return w, b

    w1b, b1b = lin(ks[0], F, (F, H), (1, H))
    w2b, b2b = lin(ks[1], H, (H, D), (1, D))
    w1c, b1c = lin(ks[2], F, (F, H), (1, H))
    w2c, b2c = lin(ks[3], H, (H, D), (1, D))
    return dict(w1b=w1b, b1b=b1b, w2b=w2b, b2b=b2b,
                w1c=w1c, b1c=b1c, w2c=w2c, b2c=b2c)


if __name__ == "__main__":
    key = jax.random.PRNGKey(0)
    k_x0, k_x1, k_y, k_t, k_z, k_p = jax.random.split(key, 6)

    x0 = jax.random.normal(k_x0, (B, D), jnp.float32)
    x1 = jax.random.normal(k_x1, (B, D), jnp.float32)
    y = jax.random.normal(k_y, (B, D), jnp.float32)
    # mc_samples ~ U(0,1), z_samples ~ N(0,1)  (as in the PyTorch forward)
    t = jax.random.uniform(k_t, (NUM_MC, B), jnp.float32)
    z = jax.random.normal(k_z, (NUM_MC, B, D), jnp.float32)
    params = _init_params(k_p)

    # Fuse weights ONCE (not on the per-call path).
    fused = jax.tree_util.tree_map(jax.block_until_ready, fuse_params(params))

    out = controlled_drift_objective_pallas(x0, x1, y, t, z, fused)
    out = jax.tree_util.tree_map(jax.block_until_ready, out)

    ref = controlled_drift_objective_ref(x0, x1, y, t, z, params)
    for name in ("loss", "b_loss", "c_loss"):
        assert jnp.allclose(out[name], ref[name], rtol=1e-2, atol=1e-3), (
            name, out[name], ref[name])

    print("KERNEL_OK")
</pallas_src>

<mosaic_0001>
module attributes {stable_mosaic.version = 11 : i64} {
  func.func @_objective_kernel(%arg0: memref<32x1xf32, #tpu.memory_space<vmem>>, %arg1: memref<32x32xf32, #tpu.memory_space<vmem>>, %arg2: memref<3x8x32xf32, #tpu.memory_space<vmem>>, %arg3: memref<128x128xf32, #tpu.memory_space<vmem>>, %arg4: memref<1x128xf32, #tpu.memory_space<vmem>>, %arg5: memref<128x64xf32, #tpu.memory_space<vmem>>, %arg6: memref<1x64xf32, #tpu.memory_space<vmem>>, %arg7: memref<8x128xf32, #tpu.memory_space<vmem>>) attributes {dimension_semantics = [], scalar_prefetch = 0 : i64, scratch_operands = 0 : i64, tpu.core_type = #tpu.core_type<tc>} {
    %c0 = arith.constant 0 : index
    %c0_0 = arith.constant 0 : index
    %0 = vector.load %arg0[%c0, %c0_0] : memref<32x1xf32, #tpu.memory_space<vmem>>, vector<32x1xf32>
    %c0_1 = arith.constant 0 : index
    %c0_2 = arith.constant 0 : index
    %1 = vector.load %arg1[%c0_1, %c0_2] : memref<32x32xf32, #tpu.memory_space<vmem>>, vector<32x32xf32>
    %c0_3 = arith.constant 0 : index
    %c0_4 = arith.constant 0 : index
    %c0_5 = arith.constant 0 : index
    %2 = vector.load %arg2[%c0_3, %c0_4, %c0_5] : memref<3x8x32xf32, #tpu.memory_space<vmem>>, vector<1x8x32xf32>
    %3 = vector.shape_cast %2 : vector<1x8x32xf32> to vector<8x32xf32>
    %c1 = arith.constant 1 : index
    %c0_6 = arith.constant 0 : index
    %c0_7 = arith.constant 0 : index
    %4 = vector.load %arg2[%c1, %c0_6, %c0_7] : memref<3x8x32xf32, #tpu.memory_space<vmem>>, vector<1x8x32xf32>
    %5 = vector.shape_cast %4 : vector<1x8x32xf32> to vector<8x32xf32>
    %c2 = arith.constant 2 : index
    %c0_8 = arith.constant 0 : index
    %c0_9 = arith.constant 0 : index
    %6 = vector.load %arg2[%c2, %c0_8, %c0_9] : memref<3x8x32xf32, #tpu.memory_space<vmem>>, vector<1x8x32xf32>
    %7 = vector.shape_cast %6 : vector<1x8x32xf32> to vector<8x32xf32>
    %8 = tpu.concatenate %3, %3, %3, %3 in 0 : vector<8x32xf32>, vector<8x32xf32>, vector<8x32xf32>, vector<8x32xf32> -> vector<32x32xf32>
    %9 = tpu.concatenate %5, %5, %5, %5 in 0 : vector<8x32xf32>, vector<8x32xf32>, vector<8x32xf32>, vector<8x32xf32> -> vector<32x32xf32>
    %10 = vector.shape_cast %0 : vector<32x1xf32> to vector<32x1xf32>
    %11 = vector.broadcast %10 : vector<32x1xf32> to vector<32x32xf32>
    %cst = arith.constant 1.000000e+00 : f32
    %12 = vector.broadcast %cst : f32 to vector<32x32xf32>
    %13 = arith.subf %12, %11 : vector<32x32xf32>
    %14 = arith.mulf %13, %8 : vector<32x32xf32>
    %15 = arith.mulf %11, %9 : vector<32x32xf32>
    %16 = arith.addf %14, %15 : vector<32x32xf32>
    %cst_10 = arith.constant 5.000000e-01 : f32
    %17 = vector.broadcast %cst_10 : f32 to vector<32x32xf32>
    %18 = arith.mulf %17, %11 : vector<32x32xf32>
    %19 = arith.mulf %18, %13 : vector<32x32xf32>
    %20 = arith.mulf %19, %1 : vector<32x32xf32>
    %21 = arith.addf %16, %20 : vector<32x32xf32>
    %22 = arith.subf %9, %8 : vector<32x32xf32>
    %cst_11 = arith.constant 2.000000e+00 : f32
    %23 = vector.broadcast %cst_11 : f32 to vector<32x32xf32>
    %24 = arith.mulf %23, %11 : vector<32x32xf32>
    %cst_12 = arith.constant 1.000000e+00 : f32
    %25 = vector.broadcast %cst_12 : f32 to vector<32x32xf32>
    %26 = arith.subf %25, %24 : vector<32x32xf32>
    %cst_13 = arith.constant 5.000000e-01 : f32
    %27 = vector.broadcast %cst_13 : f32 to vector<32x32xf32>
    %28 = arith.mulf %27, %26 : vector<32x32xf32>
    %29 = arith.mulf %28, %1 : vector<32x32xf32>
    %30 = arith.addf %22, %29 : vector<32x32xf32>
    %cst_14 = arith.constant 5.000000e-01 : f32
    %31 = vector.broadcast %cst_14 : f32 to vector<32x32xf32>
    %32 = arith.mulf %31, %13 : vector<32x32xf32>
    %c32 = arith.constant 32 : index
    %c0_15 = arith.constant 0 : index
    %33 = vector.load %arg3[%c32, %c0_15] : memref<128x128xf32, #tpu.memory_space<vmem>>, vector<32x128xf32>
    %cst_16 = arith.constant dense<0.000000e+00> : vector<8x128xf32>
    %34 = tpu.matmul %3, %33, %cst_16 {dimension_numbers = #tpu.dot_dimension_numbers<[1], [0], [0], [1], [0, 0, 1, 1], [], []>} : vector<8x32xf32>, vector<32x128xf32>, vector<8x128xf32> -> vector<8x128xf32>
    %c64 = arith.constant 64 : index
    %c0_17 = arith.constant 0 : index
    %35 = vector.load %arg3[%c64, %c0_17] : memref<128x128xf32, #tpu.memory_space<vmem>>, vector<32x128xf32>
    %cst_18 = arith.constant dense<0.000000e+00> : vector<8x128xf32>
    %36 = tpu.matmul %7, %35, %cst_18 {dimension_numbers = #tpu.dot_dimension_numbers<[1], [0], [0], [1], [0, 0, 1, 1], [], []>} : vector<8x32xf32>, vector<32x128xf32>, vector<8x128xf32> -> vector<8x128xf32>
    %37 = arith.addf %34, %36 : vector<8x128xf32>
    %c0_19 = arith.constant 0 : index
    %c0_20 = arith.constant 0 : index
    %38 = vector.load %arg4[%c0_19, %c0_20] : memref<1x128xf32, #tpu.memory_space<vmem>>, vector<1x128xf32>
    %39 = vector.broadcast %38 : vector<1x128xf32> to vector<8x128xf32>
    %40 = arith.addf %37, %39 : vector<8x128xf32>
    %41 = tpu.concatenate %40, %40, %40, %40 in 0 : vector<8x128xf32>, vector<8x128xf32>, vector<8x128xf32>, vector<8x128xf32> -> vector<32x128xf32>
    %c96 = arith.constant 96 : index
    %c0_21 = arith.constant 0 : index
    %42 = vector.load %arg3[%c96, %c0_21] : memref<128x128xf32, #tpu.memory_space<vmem>>, vector<32x128xf32>
    %cst_22 = arith.constant dense<0.000000e+00> : vector<128xf32>
    %43 = vector.multi_reduction <add>, %42, %cst_22 [0] : vector<32x128xf32> to vector<128xf32>
    %44 = vector.shape_cast %43 : vector<128xf32> to vector<1x128xf32>
    %45 = vector.broadcast %0 : vector<32x1xf32> to vector<32x128xf32>
    %46 = vector.broadcast %44 : vector<1x128xf32> to vector<32x128xf32>
    %47 = arith.mulf %45, %46 : vector<32x128xf32>
    %c0_23 = arith.constant 0 : index
    %c0_24 = arith.constant 0 : index
    %48 = vector.load %arg3[%c0_23, %c0_24] : memref<128x128xf32, #tpu.memory_space<vmem>>, vector<32x128xf32>
    %cst_25 = arith.constant dense<0.000000e+00> : vector<32x128xf32>
    %49 = tpu.matmul %21, %48, %cst_25 {dimension_numbers = #tpu.dot_dimension_numbers<[1], [0], [0], [1], [0, 0, 1, 1], [], []>} : vector<32x32xf32>, vector<32x128xf32>, vector<32x128xf32> -> vector<32x128xf32>
    %50 = arith.addf %49, %41 : vector<32x128xf32>
    %51 = arith.addf %50, %47 : vector<32x128xf32>
    %52 = math.tanh %51 : vector<32x128xf32>
    %c0_26 = arith.constant 0 : index
    %c0_27 = arith.constant 0 : index
    %53 = vector.load %arg5[%c0_26, %c0_27] : memref<128x64xf32, #tpu.memory_space<vmem>>, vector<128x64xf32>
    %cst_28 = arith.constant dense<0.000000e+00> : vector<32x64xf32>
    %54 = tpu.matmul %52, %53, %cst_28 {dimension_numbers = #tpu.dot_dimension_numbers<[1], [0], [0], [1], [0, 0, 1, 1], [], []>} : vector<32x128xf32>, vector<128x64xf32>, vector<32x64xf32> -> vector<32x64xf32>
    %c0_29 = arith.constant 0 : index
    %c0_30 = arith.constant 0 : index
    %55 = vector.load %arg6[%c0_29, %c0_30] : memref<1x64xf32, #tpu.memory_space<vmem>>, vector<1x64xf32>
    %56 = vector.broadcast %55 : vector<1x64xf32> to vector<32x64xf32>
    %57 = arith.addf %54, %56 : vector<32x64xf32>
    %58 = vector.extract_strided_slice %57 {offsets = [0, 0], sizes = [32, 32], strides = [1, 1]} : vector<32x64xf32> to vector<32x32xf32>
    %59 = vector.extract_strided_slice %57 {offsets = [0, 32], sizes = [32, 32], strides = [1, 1]} : vector<32x64xf32> to vector<32x32xf32>
    %60 = arith.subf %58, %30 : vector<32x32xf32>
    %61 = arith.mulf %60, %60 : vector<32x32xf32>
    %62 = vector.shape_cast %61 : vector<32x32xf32> to vector<1x32x32xf32>
    %cst_31 = arith.constant dense<0.000000e+00> : vector<1xf32>
    %63 = vector.multi_reduction <add>, %62, %cst_31 [1, 2] : vector<1x32x32xf32> to vector<1xf32>
    %64 = vector.shape_cast %63 : vector<1xf32> to vector<1x1x1xf32>
    %65 = vector.extract %64[0, 0, 0] : f32 from vector<1x1x1xf32>
    %cst_32 = arith.constant 9.765625E-4 : f32
    %66 = arith.mulf %65, %cst_32 : f32
    %67 = arith.mulf %59, %32 : vector<32x32xf32>
    %68 = arith.subf %67, %30 : vector<32x32xf32>
    %69 = arith.mulf %68, %68 : vector<32x32xf32>
    %70 = vector.shape_cast %69 : vector<32x32xf32> to vector<1x32x32xf32>
    %cst_33 = arith.constant dense<0.000000e+00> : vector<1xf32>
    %71 = vector.multi_reduction <add>, %70, %cst_33 [1, 2] : vector<1x32x32xf32> to vector<1xf32>
    %72 = vector.shape_cast %71 : vector<1xf32> to vector<1x1x1xf32>
    %73 = vector.extract %72[0, 0, 0] : f32 from vector<1x1x1xf32>
    %cst_34 = arith.constant 9.765625E-4 : f32
    %74 = arith.mulf %73, %cst_34 : f32
    %75 = arith.mulf %32, %59 : vector<32x32xf32>
    %76 = arith.mulf %75, %58 : vector<32x32xf32>
    %77 = vector.shape_cast %76 : vector<32x32xf32> to vector<1x32x32xf32>
    %cst_35 = arith.constant dense<0.000000e+00> : vector<1xf32>
    %78 = vector.multi_reduction <add>, %77, %cst_35 [1, 2] : vector<1x32x32xf32> to vector<1xf32>
    %79 = vector.shape_cast %78 : vector<1xf32> to vector<1x1x1xf32>
    %80 = vector.extract %79[0, 0, 0] : f32 from vector<1x1x1xf32>
    %cst_36 = arith.constant 5.000000e-01 : f32
    %81 = arith.mulf %cst_36, %80 : f32
    %82 = arith.addf %74, %81 : f32
    %83 = arith.addf %66, %82 : f32
    %84 = tpu.iota {dimensions = array<i32: 0>} : vector<8x128xi32>
    %c0_i32 = arith.constant 0 : i32
    %85 = vector.broadcast %c0_i32 : i32 to vector<8x128xi32>
    %86 = arith.cmpi eq, %84, %85 : vector<8x128xi32>
    %c1_i32 = arith.constant 1 : i32
    %87 = vector.broadcast %c1_i32 : i32 to vector<8x128xi32>
    %88 = arith.cmpi eq, %84, %87 : vector<8x128xi32>
    %c2_i32 = arith.constant 2 : i32
    %89 = vector.broadcast %c2_i32 : i32 to vector<8x128xi32>
    %90 = arith.cmpi eq, %84, %89 : vector<8x128xi32>
    %cst_37 = arith.constant 0.000000e+00 : f32
    %91 = vector.broadcast %82 : f32 to vector<8x128xf32>
    %92 = vector.broadcast %cst_37 : f32 to vector<8x128xf32>
    %93 = arith.select %90, %91, %92 : vector<8x128xi1>, vector<8x128xf32>
    %94 = vector.broadcast %66 : f32 to vector<8x128xf32>
    %95 = arith.select %88, %94, %93 : vector<8x128xi1>, vector<8x128xf32>
    %96 = vector.broadcast %83 : f32 to vector<8x128xf32>
    %97 = arith.select %86, %96, %95 : vector<8x128xi1>, vector<8x128xf32>
    %c0_38 = arith.constant 0 : index
    %c0_39 = arith.constant 0 : index
    %98 = vector.load %arg7[%c0_38, %c0_39] : memref<8x128xf32, #tpu.memory_space<vmem>>, vector<8x128xf32>
    tpu.vector_store %arg7[%c0_38, %c0_39], %97 {strides = array<i32>} : memref<8x128xf32, #tpu.memory_space<vmem>>, vector<8x128xf32>,
    return
  }
}

</mosaic_0001>

<bundles_post_ra>
// kernel: controlled_drift_objective_pallas.1
= control target key start
LH: loop header
LB: loop body
LE: loop exit
PB: predicated region body
PF: predicated region fallthrough
CT: control target
= control target key end

     0   :  { %v866_v0 = vmov 0   ;;  %v867_v7 = vmov 0.0|0.0   ;;  %vm868_vm0 = vmmov 0   ;;  %v869_v11 = vmov 0.0   ;;  %s870_s12 = smov 32   ;;  %s1154_s0 = inlined_call_operand.vmem [shape: f32[32,1], index: 0, kind: input, shape index: {}]   ;;  %s1155_s3 = inlined_call_operand.vmem [shape: f32[128,128], index: 3, kind: input, shape index: {}]   ;;  %s1156_s2 = inlined_call_operand.vmem [shape: f32[3,8,32], index: 2, kind: input, shape index: {}]   ;;  %s1157_s1 = inlined_call_operand.vmem [shape: f32[32,32], index: 1, kind: input, shape index: {}]   ;;  %s1158_s5 = inlined_call_operand.vmem [shape: f32[128,64], index: 5, kind: input, shape index: {}]   ;;  %s1159_s4 = inlined_call_operand.vmem [shape: f32[1,128], index: 4, kind: input, shape index: {}]   ;;  %s1160_s6 = inlined_call_operand.vmem [shape: f32[1,64], index: 6, kind: input, shape index: {}]   ;;  %s1161_s7 = inlined_call_operand.vmem [shape: f32[8,128], index: 7, kind: output, shape index: {}]  }
   0x1   :  { %857 = vset.pattern.permute.xlu1 %v866_v0  ;;  %856 = vset.pattern.permute.xlu0 %v866_v0  ;;  %v28_v1 = vld [vmem:[%s1154_s0 + $0x10] sm:$0xff]  ;;  %v26_v2 = vld [vmem:[%s1154_s0] sm:$0xff]  ;;  %v29_v3 = vld [vmem:[%s1154_s0 + $0x18] sm:$0xff]  ;;  %vm124_vm1 = vcmask 261120  }
   0x2   :  { %51 = vperm.xlu1 %857, %v28_v1   ;;  %41 = vperm.xlu0 %856, %v26_v2   ;;  %v120_v4 = vld [vmem:[%s1155_s3 + $0x40] sm:$0xff]  ;;  %v121_v5 = vld [vmem:[%s1155_s3 + $0x48] sm:$0xff]  ;;  %v122_v9 = vld [vmem:[%s1155_s3 + $0x50] sm:$0xff] }
   0x3   :  { %v27_v6 = vld [vmem:[%s1154_s0 + $0x8] sm:$0xff]  ;;  %792 = vmatprep.subr.bf16.mxu0 %v867_v7  ;;  %v793_v8 = vpack.c.bf16 %v121_v5, %v120_v4  ;;  %v123_v10 = vld [vmem:[%s1155_s3 + $0x58] sm:$0xff]  ;;  %726 = vmatprep.mubr.msk.f32.mxu0 %vm868_vm0, %v869_v11  ;;  %v116_v13 = vld [vmem:[%s1155_s3 + $0x20] sm:$0xff] }
   0x4   :  { %v796_v12 = vpack.c.bf16 %v123_v10, %v122_v9  ;;  %v117_v14 = vld [vmem:[%s1155_s3 + $0x28] sm:$0xff]  ;;  %v671_v15 = vld [vmem:[%s1156_s2 + $0x10] sm:$0xff]  ;;  %v119_v18 = vld [vmem:[%s1155_s3 + $0x38] sm:$0xff] }
   0x5   :  { %794 = vmatpush3.bf16.msra.mxu0 %v793_v8  ;;  %v799_v16 = vpack.c.bf16 %v117_v14, %v116_v13  ;;  %v118_v17 = vld [vmem:[%s1155_s3 + $0x30] sm:$0xff]  ;;  %v296_v19 = vld [vmem:[%s1155_s3] sm:$0xff]  ;;  %v297_v20 = vld [vmem:[%s1155_s3 + $0x8] sm:$0xff] }
   0x6   :  { %56 = vperm.xlu1 %857, %v29_v3   ;;  %46 = vperm.xlu0 %856, %v27_v6   ;;  %v802_v21 = vpack.c.bf16 %v119_v18, %v118_v17  ;;  %v804_v22 = vpack.c.bf16 %v297_v20, %v296_v19  ;;  %v298_v23 = vld [vmem:[%s1155_s3 + $0x10] sm:$0xff]  ;;  %v299_v24 = vld [vmem:[%s1155_s3 + $0x18] sm:$0xff]  ;;  %v969_v25 = vld [vmem:[%s1156_s2] sm:$0xff] }
   0x7   :  { %795 = vmatprep.subr.bf16.mxu0 %v867_v7  ;;  %v808_v26 = vpack.c.bf16 %v299_v24, %v298_v23  ;;  %v279_v27 = vld [vmem:[%s1155_s3 + $0x60] sm:$0xff]  ;;  %v280_v28 = vld [vmem:[%s1155_s3 + $0x68] sm:$0xff]  ;;  %v281_v30 = vld [vmem:[%s1155_s3 + $0x70] sm:$0xff] }
   0x8   :  { %v283_v29 = vadd.f32 %v280_v28, %v279_v27  ;;  %v282_v32 = vld [vmem:[%s1155_s3 + $0x78] sm:$0xff]  ;;  %v670_v40 = vld [vmem:[%s1156_s2 + $0x8] sm:$0xff]  ;;  %v30_v58 = vld [vmem:[%s1157_s1] sm:$0xff] }
   0x9   :  { %797 = vmatpush3.bf16.msra.mxu0 %v796_v12  ;;  %v993_v46 = vsub.f32 %v670_v40, %v969_v25  ;;  %v32_v1 = vld [vmem:[%s1157_s1 + $0x10] sm:$0xff]  ;;  %v31_v8 = vld [vmem:[%s1157_s1 + $0x8] sm:$0xff] }
   0xa   :  { %798 = vmatprep.subr.bf16.mxu0 %v867_v7  ;;  %v284_v31 = vadd.f32 %v283_v29, %v281_v30  ;;  %v407_v28 = vld [vmem:[%s1158_s5 + $0x10] sm:$0xff]  ;;  %v408_v29 = vld [vmem:[%s1158_s5 + $0x18] sm:$0xff] }
   0xc   :  { %727 = vmatmul.mubr.msk.f32.vlgmr.msra.gmra.mrb[0].mxu0 %vm124_vm1, %v671_v15  ;;  %v285_v33 = vadd.f32 %v284_v31, %v282_v32 }
   0xd   :  { %800 = vmatpush3.bf16.msra.mxu0 %v799_v16  ;;  %737 = vmatprep.mubr.msk.f32.mxu0 %vm868_vm0, %v869_v11  ;;  %v33_v16 = vld [vmem:[%s1157_s1 + $0x18] sm:$0xff] }
   0xe   :  { %801 = vmatprep.subr.bf16.mxu0 %v867_v7  ;;  %v286_v34 = vrot.slane %v285_v33, 4 }
  0x10   :  { %v287_v35 = vadd.f32 %v286_v34, %v285_v33 }
  0x11   :  { %803 = vmatpush3.bf16.msra.mxu0 %v802_v21  ;;  %v405_v21 = vld [vmem:[%s1158_s5] sm:$0xff] }
  0x12   :  { %805 = vmatprep.subr.bf16.mxu0 %v804_v22  ;;  %v288_v36 = vrot.slane %v287_v35, 2 }
  0x14   :  { %738 = vmatmul.mubr.msk.f32.vlgmr.msra.gmra.mrb[2].mxu0 %vm124_vm1, %v969_v25  ;;  %v289_v37 = vadd.f32 %v288_v36, %v287_v35 }
  0x15   :  { %807 = vmatpush3.bf16.msra.mxu0 %v804_v22  ;;  %v406_v22 = vld [vmem:[%s1158_s5 + $0x8] sm:$0xff] }
  0x16   :  { %809 = vmatprep.subr.bf16.mxu0 %v808_v26  ;;  %v290_v38 = vrot.slane %v289_v37, 1 }
  0x18   :  { %v985_v39 = vadd.f32 %v290_v38, %v289_v37 }
  0x19   :  { %811 = vmatpush3.bf16.msra.mxu0 %v808_v26 }
  0x81   :  { %v52_v41 = vpop.permute.xlu1 %51  ;;  %v42_v42 = vpop.permute.xlu0 %41 }
  0x82   :  { %v990_v43 = vsub.f32 1.0, %v52_v41  ;;  %v77_v44 = vmul.f32 0.5, %v52_v41  ;;  %v94_v45 = vmul.f32 2.0, %v52_v41  ;;  %v69_v47 = vmul.f32 %v670_v40, %v52_v41 }
  0x83   :  { %v995_v48 = vsub.f32 1.0, %v42_v42  ;;  %v75_v49 = vmul.f32 0.5, %v42_v42  ;;  %v92_v50 = vmul.f32 2.0, %v42_v42  ;;  %v67_v52 = vmul.f32 %v670_v40, %v42_v42 }
  0x84   :  { %v81_v51 = vmul.f32 %v77_v44, %v990_v43  ;;  %v65_v53 = vmul.f32 %v990_v43, %v969_v25  ;;  %v1001_v54 = vmul.f32 %v985_v39, %v42_v42  ;;  %v1014_v61 = vmul.f32 %v985_v39, %v52_v41  ;;  %v409_v42 = vld [vmem:[%s1158_s5 + $0x20] sm:$0xff]  ;;  %v410_v44 = vld [vmem:[%s1158_s5 + $0x28] sm:$0xff] }
  0x85   :  { %v79_v55 = vmul.f32 %v75_v49, %v995_v48  ;;  %v1004_v56 = vpop.permute.xlu1 %56  ;;  %v1006_v57 = vpop.permute.xlu0 %46  ;;  %v63_v59 = vmul.f32 %v995_v48, %v969_v25  ;;  %v96_v60 = vsub.f32 1.0, %v92_v50  ;;  %v98_v2 = vsub.f32 1.0, %v94_v45 }
  0x86   :  { %v1017_v62 = vsub.f32 1.0, %v1004_v56  ;;  %v78_v63 = vmul.f32 0.5, %v1004_v56  ;;  %v95_v0 = vmul.f32 2.0, %v1004_v56  ;;  %v1025_v3 = vsub.f32 1.0, %v1006_v57 }
  0x87   :  { %v68_v4 = vmul.f32 %v670_v40, %v1006_v57  ;;  %v76_v5 = vmul.f32 0.5, %v1006_v57  ;;  %v93_v6 = vmul.f32 2.0, %v1006_v57  ;;  %v71_v9 = vadd.f32 %v67_v52, %v63_v59  ;;  %v411_v52 = vld [vmem:[%s1158_s5 + $0x30] sm:$0xff] }
  0x88   :  { %v82_v7 = vmul.f32 %v78_v63, %v1017_v62  ;;  %v83_v10 = vmul.f32 %v79_v55, %v30_v58  ;;  %v100_v11 = vmul.f32 0.5, %v96_v60  ;;  %v64_v12 = vmul.f32 %v1025_v3, %v969_v25 }
  0x89   :  { %v80_v13 = vmul.f32 %v76_v5, %v1025_v3  ;;  %v73_v14 = vadd.f32 %v69_v47, %v65_v53  ;;  %v85_v15 = vmul.f32 %v81_v51, %v32_v1  ;;  %v102_v19 = vmul.f32 0.5, %v98_v2  ;;  %v412_v53 = vld [vmem:[%s1158_s5 + $0x38] sm:$0xff]  ;;  %v415_v5 = vld [vmem:[%s1158_s5 + $0x50] sm:$0xff] }
  0x8a   :  { %v87_v17 = vadd.f32 %v83_v10, %v71_v9  ;;  %v104_v18 = vmul.f32 %v100_v11, %v30_v58  ;;  %v97_v20 = vsub.f32 1.0, %v93_v6  ;;  %v70_v23 = vmul.f32 %v670_v40, %v1004_v56  ;;  %v416_v6 = vld [vmem:[%s1158_s5 + $0x58] sm:$0xff]  ;;  %v418_v9 = vld [vmem:[%s1158_s5 + $0x68] sm:$0xff]  ;;  %v419_v11 = vld [vmem:[%s1158_s5 + $0x70] sm:$0xff] }
  0x8b   :  { %v72_v24 = vadd.f32 %v68_v4, %v64_v12  ;;  %v84_v26 = vmul.f32 %v80_v13, %v31_v8  ;;  %v66_v27 = vmul.f32 %v1017_v62, %v969_v25  ;;  %v106_v31 = vmul.f32 %v102_v19, %v32_v1  ;;  %v420_v12 = vld [vmem:[%s1158_s5 + $0x78] sm:$0xff] }
  0x8c   :  { %748 = vmatprep.mubr.msk.f32.mxu0 %vm124_vm1, %v87_v17  ;;  %v1057_v30 = vadd.f32 %v104_v18, %v993_v46  ;;  %v101_v32 = vmul.f32 0.5, %v97_v20  ;;  %v86_v33 = vmul.f32 %v82_v7, %v33_v16  ;;  %v99_v36 = vsub.f32 1.0, %v95_v0  ;;  %v413_v0 = vld [vmem:[%s1158_s5 + $0x40] sm:$0xff] }
  0x8d   :  { %v88_v34 = vadd.f32 %v84_v26, %v72_v24  ;;  %v74_v35 = vadd.f32 %v70_v23, %v66_v27  ;;  %v812_v25 = vpack.c.bf16 %v406_v22, %v405_v21  ;;  %v89_v37 = vadd.f32 %v85_v15, %v73_v14  ;;  %v417_v7 = vld [vmem:[%s1158_s5 + $0x60] sm:$0xff] }
  0x8e   :  { %546 = vrot.lane.b32.xlu0 %v1057_v30, %s870_s12  ;;  %v1062_v38 = vadd.f32 %v106_v31, %v993_v46  ;;  %v105_v40 = vmul.f32 %v101_v32, %v31_v8  ;;  %v816_v41 = vpack.c.bf16 %v408_v29, %v407_v28  ;;  %v103_v45 = vmul.f32 0.5, %v99_v36  ;;  %v674_v14 = vld [vmem:[%s1159_s4] ss:$0 sm:$0xff] }
  0x8f   :  { %749 = vmatmul.mubr.msk.f32.vlgmr.msra.gmra.mrb[4].mxu0 %vm124_vm1, %v88_v34  ;;  %813 = vmatprep.subr.bf16.mxu1 %v812_v25  ;;  %v90_v49 = vadd.f32 %v86_v33, %v74_v35  ;;  %v820_v51 = vpack.c.bf16 %v410_v44, %v409_v42  ;;  %v824_v58 = vpack.c.bf16 %v412_v53, %v411_v52  ;;  %v113_v34 = vmul.f32 0.5, %v1025_v3 }
  0x90   :  { %751 = vmatprep.mubr.msk.f32.mxu0 %vm124_vm1, %v89_v37  ;;  %v1073_v47 = vadd.f32 %v105_v40, %v993_v46  ;;  %815 = vmatpush3.bf16.msra.mxu1 %v812_v25  ;;  %v107_v50 = vmul.f32 %v103_v45, %v33_v16  ;;  %v832_v8 = vpack.c.bf16 %v416_v6, %v415_v5 }
  0x91   :  { %817 = vmatprep.subr.bf16.mxu1 %v816_v41  ;;  %v836_v10 = vpack.c.bf16 %v418_v9, %v417_v7  ;;  %v840_v13 = vpack.c.bf16 %v420_v12, %v419_v11  ;;  %v293_v17 = vmul.f32 %v985_v39, %v1006_v57  ;;  %v295_v24 = vmul.f32 %v985_v39, %v1004_v56  ;;  %v679_v39 = vld [vmem:[%s1160_s6] ss:$0 sm:$0xff]  ;;  %s871_s6 = smov 96  }
  0x92   :  { %550 = vrot.lane.b32.xlu0 %v1062_v38, %s870_s12  ;;  %548 = vrot.lane.b32.xlu1 %v1073_v47, %s870_s12  ;;  %v1087_v55 = vadd.f32 %v107_v50, %v993_v46  ;;  %v414_v46 = vld [vmem:[%s1158_s5 + $0x48] sm:$0xff] }
  0x93   :  { %752 = vmatmul.mubr.msk.f32.gmra.mrb[6].mxu0 %vm124_vm1, %v90_v49  ;;  %v828_v4 = vpack.c.bf16 %v414_v46, %v413_v0 }
  0x94   :  { %819 = vmatpush3.bf16.msra.mxu1 %v816_v41 }
  0x95   :  { %821 = vmatprep.subr.bf16.mxu1 %v820_v51 }
  0x96   :  { %552 = vrot.lane.b32.xlu1 %v1087_v55, %s870_s12 }
  0x98   :  { %823 = vmatpush3.bf16.msra.mxu1 %v820_v51 }
  0x99   :  { %825 = vmatprep.subr.bf16.mxu1 %v824_v58 }
  0x9c   :  { %827 = vmatpush3.bf16.msra.mxu1 %v824_v58  ;;  %v114_v58 = vmul.f32 0.5, %v990_v43 }
  0x9d   :  { %829 = vmatprep.subr.bf16.mxu1 %v828_v4 }
  0xa0   :  { %831 = vmatpush3.bf16.msra.mxu1 %v828_v4 }
  0xa1   :  { %833 = vmatprep.subr.bf16.mxu1 %v832_v8 }
  0xa4   :  { %835 = vmatpush3.bf16.msra.mxu1 %v832_v8 }
  0xa5   :  { %837 = vmatprep.subr.bf16.mxu1 %v836_v10 }
  0xa8   :  { %839 = vmatpush3.bf16.msra.mxu1 %v836_v10 }
  0xa9   :  { %841 = vmatprep.subr.bf16.mxu1 %v840_v13 }
  0xac   :  { %843 = vmatpush3.bf16.msra.mxu1 %v840_v13 }
  0xdf   :  { %v194_v59 = vpop.f32.mrb[0].mxu0 }
  0xe0   :  { %v728_v60 = vpop.f32.mrb[1].mxu0 }
  0xe7   :  { %v267_v63 = vpop.f32.mrb[2].mxu0 }
  0xe8   :  { %v268_v1 = vadd.f32 %v267_v63, %v194_v59  ;;  %v739_v2 = vpop.f32.mrb[3].mxu0 }
  0xea   :  { %v278_v15 = vadd.f32 %v674_v14, %v268_v1 }
 0x100   :  { %v547_v37 = vpop.permute.xlu0 %546 }
 0x104   :  { %v549_v42 = vpop.permute.xlu1 %548 }
 0x108   :  { %v553_v11 = vpop.permute.xlu1 %552 }
 0x162   :  { %v750_v16 = vpop.f32.mrb[4].mxu0 }
 0x163   :  { %v384_v18 = vadd.f32 %v750_v16, %v278_v15  ;;  %v378_v19 = vpop.f32.mrb[5].mxu0 }
 0x164   :  { %v379_v20 = vadd.f32 %v378_v19, %v278_v15 }
 0x165   :  { %v398_v21 = vadd.f32 %v384_v18, %v293_v17 }
 0x166   :  { %v397_v22 = vadd.f32 %v379_v20, %v1001_v54  ;;  %v753_v23 = vpop.f32.mrb[6].mxu0 }
 0x167   :  { %v394_v26 = vadd.f32 %v753_v23, %v278_v15  ;;  %v388_v27 = vpop.f32.mrb[7].mxu0 }
 0x168   :  { %v389_v28 = vadd.f32 %v388_v27, %v278_v15  ;;  %858 = vtanh.f32 %v397_v22 }
 0x169   :  { %860 = vtanh.f32 %v398_v21  ;;  %v400_v29 = vadd.f32 %v394_v26, %v295_v24 }
 0x16a   :  { %v399_v31 = vadd.f32 %v389_v28, %v1014_v61  ;;  %v112_v61 = vmul.f32 0.5, %v995_v48  ;;  %v115_v48 = vmul.f32 0.5, %v1017_v62  ;;  %v551_v62 = vpop.permute.xlu0 %550 }
 0x16c   :  { %862 = vtanh.f32 %v399_v31 }
 0x16d   :  { %864 = vtanh.f32 %v400_v29 }
 0x172   :  { %v859_v57 = vpop.eup %858 }
 0x173   :  { %v861_v32 = vpop.eup %860  ;;  %786 = vmatprep.mubr.f32.mxu1 %v859_v57 }
 0x174   :  { %787 = vmatmul.mubr.f32.vlgmr.msra.gmra.mrb[0].mxu1 %v861_v32 }
 0x176   :  { %v863_v33 = vpop.eup %862 }
 0x177   :  { %v865_v54 = vpop.eup %864  ;;  %789 = vmatprep.mubr.f32.mxu1 %v863_v33 }
 0x178   :  { %790 = vmatmul.mubr.f32.gmra.mrb[2].mxu1 %v865_v54 }
 0x247   :  { %v788_v56 = vpop.f32.mrb[0].mxu1 }
 0x248   :  { %v500_v35 = vadd.f32 %v788_v56, %v679_v39  ;;  %v494_v36 = vpop.f32.mrb[1].mxu1 }
 0x249   :  { %v495_v25 = vadd.f32 %v679_v39, %v494_v36 }
 0x24a   :  { %v514_v40 = vsub.f32 %v500_v35, %v1073_v47  ;;  %v539_v41 = vmul.f32 %v500_v35, %v113_v34  ;;  %605 = vrot.lane.b32.xlu0 %v500_v35, %s870_s12 }
 0x24b   :  { %v513_v44 = vsub.f32 %v495_v25, %v1057_v30  ;;  %v538_v45 = vmul.f32 %v495_v25, %v112_v61  ;;  %v791_v49 = vpop.f32.mrb[2].mxu1  ;;  %603 = vrot.lane.b32.xlu1 %v495_v25, %s870_s12 }
 0x24c   :  { %v518_v50 = vmul.f32 %v514_v40, %v514_v40  ;;  %v510_v3 = vadd.f32 %v791_v49, %v679_v39  ;;  %v504_v51 = vpop.f32.mrb[3].mxu1  ;;  %v559_v52 = vsub.f32 %v539_v41, %v549_v42 }
 0x24d   :  { %v517_v53 = vmul.f32 %v513_v44, %v513_v44  ;;  %v505_v47 = vadd.f32 %v679_v39, %v504_v51  ;;  %v558_v59 = vsub.f32 %v538_v45, %v547_v37 }
 0x24e   :  { %v541_v60 = vmul.f32 %v510_v3, %v115_v48  ;;  %v516_v63 = vsub.f32 %v510_v3, %v1087_v55  ;;  %v522_v30 = vsel %vm124_vm1, %v518_v50, 0.0  ;;  %v563_v2 = vmul.f32 %v559_v52, %v559_v52 }
 0x24f   :  { %v515_v0 = vsub.f32 %v505_v47, %v1062_v38  ;;  %v540_v46 = vmul.f32 %v505_v47, %v114_v58  ;;  %607 = vrot.lane.b32.xlu0 %v505_v47, %s870_s12  ;;  %609 = vrot.lane.b32.xlu1 %v510_v3, %s870_s12  ;;  %v521_v1 = vsel %vm124_vm1, %v517_v53, 0.0  ;;  %v562_v5 = vmul.f32 %v558_v59, %v558_v59 }
 0x250   :  { %v523_v4 = vadd.f32 %v522_v30, %v521_v1  ;;  %v520_v7 = vmul.f32 %v516_v63, %v516_v63  ;;  %v561_v16 = vsub.f32 %v541_v60, %v553_v11 }
 0x251   :  { %v519_v43 = vmul.f32 %v515_v0, %v515_v0  ;;  %v560_v6 = vsub.f32 %v540_v46, %v551_v62 }
 0x252   :  { %v526_v9 = vsel %vm124_vm1, %v520_v7, 0.0  ;;  %v565_v19 = vmul.f32 %v561_v16, %v561_v16 }
 0x253   :  { %572 = vrot.lane.b32.xlu1 %v563_v2, %s871_s6  ;;  %570 = vrot.lane.b32.xlu0 %v562_v5, %s871_s6  ;;  %v524_v55 = vsel %vm124_vm1, %v519_v43, 0.0  ;;  %v564_v8 = vmul.f32 %v560_v6, %v560_v6 }
 0x254   :  { %v525_v38 = vadd.f32 %v524_v55, %v523_v4  ;;  %v654_v4 = vlaneseq }
 0x256   :  { %v527_v10 = vadd.f32 %v526_v9, %v525_v38  ;;  %v655_v43 = vshrl.u32 %v654_v4, 7 }
 0x257   :  { %574 = vrot.lane.b32.xlu0 %v564_v8, %s871_s6 }
 0x258   :  { %vm658_vm2 = vcmp.eq.s32.totalorder %v655_v43, 2  ;;  %vm657_vm3 = vcmp.eq.s32.totalorder %v655_v43, 1  ;;  %vm656_vm4 = vcmp.eq.s32.totalorder %v655_v43, 0 }
 0x2bc   :  { %v606_v12 = vpop.permute.xlu0 %605 }
 0x2bd   :  { %v616_v13 = vmul.f32 %v606_v12, %v539_v41  ;;  %v604_v14 = vpop.permute.xlu1 %603 }
 0x2be   :  { %v615_v15 = vmul.f32 %v604_v14, %v538_v45 }
 0x2bf   :  { %625 = vrot.lane.b32.xlu1 %v616_v13, %s871_s6 }
 0x2c0   :  { %623 = vrot.lane.b32.xlu0 %v615_v15, %s871_s6 }
 0x2c1   :  { %v608_v17 = vpop.permute.xlu0 %607  ;;  %v610_v20 = vpop.permute.xlu1 %609 }
 0x2c2   :  { %v617_v18 = vmul.f32 %v608_v17, %v540_v46  ;;  %v618_v21 = vmul.f32 %v610_v20, %v541_v60 }
 0x2c4   :  { %576 = vrot.lane.b32.xlu0 %v565_v19, %s871_s6  ;;  %627 = vrot.lane.b32.xlu1 %v617_v18, %s871_s6 }
 0x2c5   :  { %v571_v22 = vpop.permute.xlu0 %570  ;;  %v573_v23 = vpop.permute.xlu1 %572 }
 0x2c6   :  { %v583_v26 = vsel %vm124_vm1, %v573_v23, 0.0  ;;  %v582_v27 = vsel %vm124_vm1, %v571_v22, 0.0 }
 0x2c7   :  { %v584_v57 = vadd.f32 %v583_v26, %v582_v27 }
 0x2c8   :  { %629 = vrot.lane.b32.xlu1 %v618_v21, %s871_s6 }
 0x2c9   :  { %v575_v24 = vpop.permute.xlu0 %574 }
 0x2ca   :  { %v585_v31 = vsel %vm124_vm1, %v575_v24, 0.0 }
 0x2cb   :  { %v586_v54 = vadd.f32 %v585_v31, %v584_v57 }
 0x2e3   :  { %528 = vadd.xlane.f32.xlu0 %v527_v10 }
 0x331   :  { %v626_v28 = vpop.permute.xlu1 %625 }
 0x332   :  { %v624_v29 = vpop.permute.xlu0 %623  ;;  %v636_v32 = vsel %vm124_vm1, %v626_v28, 0.0 }
 0x333   :  { %v635_v33 = vsel %vm124_vm1, %v624_v29, 0.0 }
 0x334   :  { %v637_v36 = vadd.f32 %v636_v32, %v635_v33 }
 0x336   :  { %v628_v39 = vpop.permute.xlu1 %627  ;;  %v577_v56 = vpop.permute.xlu0 %576 }
 0x337   :  { %v638_v34 = vsel %vm124_vm1, %v628_v39, 0.0  ;;  %v587_v35 = vsel %vm124_vm1, %v577_v56, 0.0 }
 0x338   :  { %v588_v61 = vadd.f32 %v587_v35, %v586_v54  ;;  %v639_v25 = vadd.f32 %v638_v34, %v637_v36 }
 0x33a   :  { %v630_v37 = vpop.permute.xlu1 %629  ;;  %589 = vadd.xlane.f32.xlu1 %v588_v61 }
 0x33b   :  { %v640_v40 = vsel %vm124_vm1, %v630_v37, 0.0 }
 0x33c   :  { %v641_v41 = vadd.f32 %v640_v40, %v639_v25 }
 0x33e   :  { %642 = vadd.xlane.f32.xlu0 %v641_v41 }
 0x370   :  { %v529_v42 = vpop.xlane.xlu0 %528 }
 0x371   :  { %v530_v44 = vrot.slane %v529_v42, 4 }
 0x373   :  { %v531_v45 = vadd.f32 %v530_v44, %v529_v42 }
 0x375   :  { %v532_v49 = vrot.slane %v531_v45, 2 }
 0x377   :  { %v533_v50 = vadd.f32 %v532_v49, %v531_v45 }
 0x379   :  { %v534_v3 = vrot.slane %v533_v50, 1 }
 0x37b   :  { %v535_v51 = vadd.f32 %v534_v3, %v533_v50 }
 0x37d   :  { %844 = vpush %v535_v51 }
 0x3ae   :  { %s845_s12 = spop %844 }
 0x3af   :  { %s537_s0 = smul.f32 0.0009765625, %s845_s12 }
 0x3b1   :  { %v661_v6 = vstv %s537_s0 }
 0x3c7   :  { %v590_v52 = vpop.xlane.xlu1 %589 }
 0x3c8   :  { %v591_v48 = vrot.slane %v590_v52, 4 }
 0x3ca   :  { %v592_v53 = vadd.f32 %v591_v48, %v590_v52 }
 0x3cb   :  { %v643_v58 = vpop.xlane.xlu0 %642 }
 0x3cc   :  { %v593_v47 = vrot.slane %v592_v53, 2  ;;  %v644_v59 = vrot.slane %v643_v58, 4 }
 0x3ce   :  { %v594_v60 = vadd.f32 %v593_v47, %v592_v53  ;;  %v645_v63 = vadd.f32 %v644_v59, %v643_v58 }
 0x3d0   :  { %v646_v30 = vrot.slane %v645_v63, 2  ;;  %v595_v0 = vrot.slane %v594_v60, 1 }
 0x3d2   :  { %v647_v46 = vadd.f32 %v646_v30, %v645_v63  ;;  %v596_v1 = vadd.f32 %v595_v0, %v594_v60 }
 0x3d4   :  { %846 = vpush %v596_v1  ;;  %v648_v62 = vrot.slane %v647_v46, 1 }
 0x3d6   :  { %v649_v2 = vadd.f32 %v648_v62, %v647_v46 }
 0x3d8   :  { %848 = vpush %v649_v2 }
 0x405   :  { %s847_s13 = spop %846 }
 0x406   :  { %s598_s14 = smul.f32 0.0009765625, %s847_s13 }
 0x409   :  { %s849_s15 = spop %848 }
 0x40a   :  { %s651_s16 = smul.f32 0.5, %s849_s15 }
 0x40c   :  { %s652_s17 = sadd.f32 %s651_s16, %s598_s14 }
 0x40e   :  { %s653_s18 = sadd.f32 %s652_s17, %s537_s0  ;;  %v659_v5 = vstv %s652_s17 }
 0x40f   :  { %v660_v7 = vsel %vm658_vm2, %v659_v5, 0.0 }
 0x410   :  { %v662_v55 = vsel %vm657_vm3, %v661_v6, %v660_v7  ;;  %v663_v38 = vstv %s653_s18 }
 0x411   :  { %v664_v8 = vsel %vm656_vm4, %v663_v38, %v662_v55 }
 0x412   :  { %665 = vst [vmem:[%s1161_s7] sm:$0xff] %v664_v8 }

</bundles_post_ra>
